<compile_context>
chip_gen: v7x
topology: tpu7x:2x2x1
jax: 0.10.0
libtpu: 0.0.40
codegen_flags: <defaults>
</compile_context>

<pallas_src>
import functools

import jax
import jax.numpy as jnp
from jax.experimental import pallas as pl
from jax.experimental.pallas import tpu as pltpu


def _make_kernel(unique_tasks, task_mask, batch):
    """Builds the fused multi-task CE kernel for a static task configuration."""
    inv_b = 1.0 / float(batch)                       # compile-time 1/B (reduction='mean')
    pos = {u: i for i, u in enumerate(unique_tasks)}  # task id -> logit ref position

    def kernel(targets_ref, *rest):
        # targets_ref : (B, T_total) int32 in VMEM
        # rest[:-1]   : one (B, C_t) logits ref per unique task, native dtype, VMEM
        # rest[-1]    : (1, 128) f32 output row in VMEM
        logit_refs = rest[:-1]
        out_ref = rest[-1]
        targets = targets_ref[...]                   # (B, T_total) int32

        def per_sample_nll(task):
            logits = logit_refs[pos[task]][...].astype(jnp.float32)   # (B, C_t)
            b, c = logits.shape
            tgt = targets[:, task:task + 1]                           # (B, 1) int32

            # Numerically-stable log-sum-exp over the class (lane) axis.
            m = jnp.max(logits, axis=-1, keepdims=True)               # (B, 1)
            lse = jnp.log(jnp.sum(jnp.exp(logits - m),
                                  axis=-1, keepdims=True)) + m        # (B, 1)

            # One-hot gather of the target-class logit (VPU compare+select).
            # TODO(synk): no ignore_index / out-of-range-label check (torch raises;
            # here an out-of-range label silently contributes tgt_logit = 0).
            lane = jax.lax.broadcasted_iota(jnp.int32, (b, c), 1)
            tgt_logit = jnp.sum(jnp.where(lane == tgt, logits, 0.0),
                                axis=-1, keepdims=True)               # (B, 1)
            return lse - tgt_logit                                    # (B, 1) per-sample NLL

        per = {u: per_sample_nll(u) for u in unique_tasks}            # static unroll

        label_vec = per[0]
        cls_vec = label_vec
        for i in task_mask:            # task mask is baked in at trace time
            cls_vec = cls_vec + per[i]

        # Batch mean via compile-time 1/B; only two sublane reductions total.
        label_loss = jnp.sum(label_vec, axis=0, keepdims=True) * inv_b   # (1, 1)
        cls_loss = jnp.sum(cls_vec, axis=0, keepdims=True) * inv_b       # (1, 1)

        # Lane-dense output row: lane 0 = classificationLoss, lane 1 = labelLoss.
        lane_idx = jax.lax.broadcasted_iota(jnp.int32, (1, 128), 1)
        out_ref[...] = (jnp.where(lane_idx == 0, cls_loss, 0.0)
                        + jnp.where(lane_idx == 1, label_loss, 0.0))

    return kernel


@functools.partial(jax.jit, static_argnums=(0,))
def _fused_multitask_ce(spec, target_class, *unique_logits):
    """spec = (unique_tasks, task_mask); returns (classification_loss, label_loss)."""
    unique_tasks, task_mask = spec
    batch = unique_logits[0].shape[0]
    kernel = _make_kernel(unique_tasks, task_mask, batch)
    n_in = 1 + len(unique_logits)

    out = pl.pallas_call(
        kernel,
        out_shape=jax.ShapeDtypeStruct((1, 128), jnp.float32),
        in_specs=[pl.BlockSpec(memory_space=pltpu.MemorySpace.VMEM)] * n_in,
        out_specs=pl.BlockSpec(memory_space=pltpu.MemorySpace.VMEM),
    )(target_class.astype(jnp.int32), *unique_logits)

    return out[0, 0], out[0, 1]


class MultiTaskCrossEntropyLoss:
    """JAX/Pallas port of the PyTorch module (the loss module has no parameters)."""

    def __init__(self, task_mask=range(1, 11)):
        self.task_mask = tuple(task_mask)
        self.unique_tasks = tuple(sorted(set((0,) + self.task_mask)))

    def __call__(self, output_class, target_class, net=None):
        # output_class: sequence of (B, C_t) logits, one per task (task 0 .. T-1)
        # target_class: (B, T) integer labels
        unique_logits = [output_class[u] for u in self.unique_tasks]
        spec = (self.unique_tasks, self.task_mask)
        return _fused_multitask_ce(spec, target_class, *unique_logits)


def _reference(output_class, target_class, task_mask):
    """Pure-JAX reference matching nn.CrossEntropyLoss(reduction='mean')."""
    def ce(logits, labels):
        logp = jax.nn.log_softmax(logits.astype(jnp.float32), axis=-1)
        return -jnp.mean(jnp.take_along_axis(logp, labels[:, None], axis=-1))
    label_loss = ce(output_class[0], target_class[:, 0])
    cls = label_loss
    for i in task_mask:
        cls = cls + ce(output_class[i], target_class[:, i])
    return cls, label_loss


if __name__ == "__main__":
    # Small synthetic shapes implied by the forward pass: 11 tasks (0 + TaskMask 1..10),
    # batch = 8, classes-per-task = 16.
    T, B, C = 11, 8, 16
    key = jax.random.PRNGKey(0)
    k_logits, k_targets = jax.random.split(key)

    logit_keys = jax.random.split(k_logits, T)
    output_class = [jax.random.normal(logit_keys[i], (B, C), dtype=jnp.float32)
                    for i in range(T)]
    target_class = jax.random.randint(k_targets, (B, T), 0, C, dtype=jnp.int32)

    loss_fn = MultiTaskCrossEntropyLoss(task_mask=range(1, 11))
    classification_loss, label_loss = loss_fn(output_class, target_class)
    jax.block_until_ready((classification_loss, label_loss))

    ref_cls, ref_lbl = _reference(output_class, target_class, tuple(range(1, 11)))
    assert jnp.allclose(classification_loss, ref_cls, rtol=1e-5, atol=1e-5), (
        classification_loss, ref_cls)
    assert jnp.allclose(label_loss, ref_lbl, rtol=1e-5, atol=1e-5), (label_loss, ref_lbl)

    print("KERNEL_OK")
</pallas_src>

<mosaic_0001>
module attributes {stable_mosaic.version = 11 : i64} {
  func.func @kernel(%arg0: memref<8x11xi32, #tpu.memory_space<vmem>>, %arg1: memref<8x16xf32, #tpu.memory_space<vmem>>, %arg2: memref<8x16xf32, #tpu.memory_space<vmem>>, %arg3: memref<8x16xf32, #tpu.memory_space<vmem>>, %arg4: memref<8x16xf32, #tpu.memory_space<vmem>>, %arg5: memref<8x16xf32, #tpu.memory_space<vmem>>, %arg6: memref<8x16xf32, #tpu.memory_space<vmem>>, %arg7: memref<8x16xf32, #tpu.memory_space<vmem>>, %arg8: memref<8x16xf32, #tpu.memory_space<vmem>>, %arg9: memref<8x16xf32, #tpu.memory_space<vmem>>, %arg10: memref<8x16xf32, #tpu.memory_space<vmem>>, %arg11: memref<8x16xf32, #tpu.memory_space<vmem>>, %arg12: memref<1x128xf32, #tpu.memory_space<vmem>>) attributes {dimension_semantics = [], scalar_prefetch = 0 : i64, scratch_operands = 0 : i64, tpu.core_type = #tpu.core_type<tc>} {
    %c0 = arith.constant 0 : index
    %c0_0 = arith.constant 0 : index
    %0 = vector.load %arg0[%c0, %c0_0] : memref<8x11xi32, #tpu.memory_space<vmem>>, vector<8x11xi32>
    %c0_1 = arith.constant 0 : index
    %c0_2 = arith.constant 0 : index
    %1 = vector.load %arg1[%c0_1, %c0_2] : memref<8x16xf32, #tpu.memory_space<vmem>>, vector<8x16xf32>
    %2 = vector.extract_strided_slice %0 {offsets = [0, 0], sizes = [8, 1], strides = [1, 1]} : vector<8x11xi32> to vector<8x1xi32>
    %cst = arith.constant dense<0xFF800000> : vector<8xf32>
    %3 = vector.multi_reduction <maximumf>, %1, %cst [1] : vector<8x16xf32> to vector<8xf32>
    %4 = vector.shape_cast %3 : vector<8xf32> to vector<8x1xf32>
    %5 = vector.broadcast %4 : vector<8x1xf32> to vector<8x16xf32>
    %6 = arith.subf %1, %5 : vector<8x16xf32>
    %7 = math.exp %6 : vector<8x16xf32>
    %cst_3 = arith.constant dense<0.000000e+00> : vector<8xf32>
    %8 = vector.multi_reduction <add>, %7, %cst_3 [1] : vector<8x16xf32> to vector<8xf32>
    %9 = vector.shape_cast %8 : vector<8xf32> to vector<8x1xf32>
    %10 = math.log %9 : vector<8x1xf32>
    %11 = arith.addf %10, %4 : vector<8x1xf32>
    %12 = tpu.iota {dimensions = array<i32: 1>} : vector<8x16xi32>
    %13 = vector.broadcast %2 : vector<8x1xi32> to vector<8x16xi32>
    %14 = arith.cmpi eq, %12, %13 : vector<8x16xi32>
    %cst_4 = arith.constant 0.000000e+00 : f32
    %15 = vector.broadcast %cst_4 : f32 to vector<8x16xf32>
    %16 = arith.select %14, %1, %15 : vector<8x16xi1>, vector<8x16xf32>
    %cst_5 = arith.constant dense<0.000000e+00> : vector<8xf32>
    %17 = vector.multi_reduction <add>, %16, %cst_5 [1] : vector<8x16xf32> to vector<8xf32>
    %18 = vector.shape_cast %17 : vector<8xf32> to vector<8x1xf32>
    %19 = arith.subf %11, %18 : vector<8x1xf32>
    %c0_6 = arith.constant 0 : index
    %c0_7 = arith.constant 0 : index
    %20 = vector.load %arg2[%c0_6, %c0_7] : memref<8x16xf32, #tpu.memory_space<vmem>>, vector<8x16xf32>
    %21 = vector.extract_strided_slice %0 {offsets = [0, 1], sizes = [8, 1], strides = [1, 1]} : vector<8x11xi32> to vector<8x1xi32>
    %cst_8 = arith.constant dense<0xFF800000> : vector<8xf32>
    %22 = vector.multi_reduction <maximumf>, %20, %cst_8 [1] : vector<8x16xf32> to vector<8xf32>
    %23 = vector.shape_cast %22 : vector<8xf32> to vector<8x1xf32>
    %24 = vector.broadcast %23 : vector<8x1xf32> to vector<8x16xf32>
    %25 = arith.subf %20, %24 : vector<8x16xf32>
    %26 = math.exp %25 : vector<8x16xf32>
    %cst_9 = arith.constant dense<0.000000e+00> : vector<8xf32>
    %27 = vector.multi_reduction <add>, %26, %cst_9 [1] : vector<8x16xf32> to vector<8xf32>
    %28 = vector.shape_cast %27 : vector<8xf32> to vector<8x1xf32>
    %29 = math.log %28 : vector<8x1xf32>
    %30 = arith.addf %29, %23 : vector<8x1xf32>
    %31 = tpu.iota {dimensions = array<i32: 1>} : vector<8x16xi32>
    %32 = vector.broadcast %21 : vector<8x1xi32> to vector<8x16xi32>
    %33 = arith.cmpi eq, %31, %32 : vector<8x16xi32>
    %cst_10 = arith.constant 0.000000e+00 : f32
    %34 = vector.broadcast %cst_10 : f32 to vector<8x16xf32>
    %35 = arith.select %33, %20, %34 : vector<8x16xi1>, vector<8x16xf32>
    %cst_11 = arith.constant dense<0.000000e+00> : vector<8xf32>
    %36 = vector.multi_reduction <add>, %35, %cst_11 [1] : vector<8x16xf32> to vector<8xf32>
    %37 = vector.shape_cast %36 : vector<8xf32> to vector<8x1xf32>
    %38 = arith.subf %30, %37 : vector<8x1xf32>
    %c0_12 = arith.constant 0 : index
    %c0_13 = arith.constant 0 : index
    %39 = vector.load %arg3[%c0_12, %c0_13] : memref<8x16xf32, #tpu.memory_space<vmem>>, vector<8x16xf32>
    %40 = vector.extract_strided_slice %0 {offsets = [0, 2], sizes = [8, 1], strides = [1, 1]} : vector<8x11xi32> to vector<8x1xi32>
    %cst_14 = arith.constant dense<0xFF800000> : vector<8xf32>
    %41 = vector.multi_reduction <maximumf>, %39, %cst_14 [1] : vector<8x16xf32> to vector<8xf32>
    %42 = vector.shape_cast %41 : vector<8xf32> to vector<8x1xf32>
    %43 = vector.broadcast %42 : vector<8x1xf32> to vector<8x16xf32>
    %44 = arith.subf %39, %43 : vector<8x16xf32>
    %45 = math.exp %44 : vector<8x16xf32>
    %cst_15 = arith.constant dense<0.000000e+00> : vector<8xf32>
    %46 = vector.multi_reduction <add>, %45, %cst_15 [1] : vector<8x16xf32> to vector<8xf32>
    %47 = vector.shape_cast %46 : vector<8xf32> to vector<8x1xf32>
    %48 = math.log %47 : vector<8x1xf32>
    %49 = arith.addf %48, %42 : vector<8x1xf32>
    %50 = tpu.iota {dimensions = array<i32: 1>} : vector<8x16xi32>
    %51 = vector.broadcast %40 : vector<8x1xi32> to vector<8x16xi32>
    %52 = arith.cmpi eq, %50, %51 : vector<8x16xi32>
    %cst_16 = arith.constant 0.000000e+00 : f32
    %53 = vector.broadcast %cst_16 : f32 to vector<8x16xf32>
    %54 = arith.select %52, %39, %53 : vector<8x16xi1>, vector<8x16xf32>
    %cst_17 = arith.constant dense<0.000000e+00> : vector<8xf32>
    %55 = vector.multi_reduction <add>, %54, %cst_17 [1] : vector<8x16xf32> to vector<8xf32>
    %56 = vector.shape_cast %55 : vector<8xf32> to vector<8x1xf32>
    %57 = arith.subf %49, %56 : vector<8x1xf32>
    %c0_18 = arith.constant 0 : index
    %c0_19 = arith.constant 0 : index
    %58 = vector.load %arg4[%c0_18, %c0_19] : memref<8x16xf32, #tpu.memory_space<vmem>>, vector<8x16xf32>
    %59 = vector.extract_strided_slice %0 {offsets = [0, 3], sizes = [8, 1], strides = [1, 1]} : vector<8x11xi32> to vector<8x1xi32>
    %cst_20 = arith.constant dense<0xFF800000> : vector<8xf32>
    %60 = vector.multi_reduction <maximumf>, %58, %cst_20 [1] : vector<8x16xf32> to vector<8xf32>
    %61 = vector.shape_cast %60 : vector<8xf32> to vector<8x1xf32>
    %62 = vector.broadcast %61 : vector<8x1xf32> to vector<8x16xf32>
    %63 = arith.subf %58, %62 : vector<8x16xf32>
    %64 = math.exp %63 : vector<8x16xf32>
    %cst_21 = arith.constant dense<0.000000e+00> : vector<8xf32>
    %65 = vector.multi_reduction <add>, %64, %cst_21 [1] : vector<8x16xf32> to vector<8xf32>
    %66 = vector.shape_cast %65 : vector<8xf32> to vector<8x1xf32>
    %67 = math.log %66 : vector<8x1xf32>
    %68 = arith.addf %67, %61 : vector<8x1xf32>
    %69 = tpu.iota {dimensions = array<i32: 1>} : vector<8x16xi32>
    %70 = vector.broadcast %59 : vector<8x1xi32> to vector<8x16xi32>
    %71 = arith.cmpi eq, %69, %70 : vector<8x16xi32>
    %cst_22 = arith.constant 0.000000e+00 : f32
    %72 = vector.broadcast %cst_22 : f32 to vector<8x16xf32>
    %73 = arith.select %71, %58, %72 : vector<8x16xi1>, vector<8x16xf32>
    %cst_23 = arith.constant dense<0.000000e+00> : vector<8xf32>
    %74 = vector.multi_reduction <add>, %73, %cst_23 [1] : vector<8x16xf32> to vector<8xf32>
    %75 = vector.shape_cast %74 : vector<8xf32> to vector<8x1xf32>
    %76 = arith.subf %68, %75 : vector<8x1xf32>
    %c0_24 = arith.constant 0 : index
    %c0_25 = arith.constant 0 : index
    %77 = vector.load %arg5[%c0_24, %c0_25] : memref<8x16xf32, #tpu.memory_space<vmem>>, vector<8x16xf32>
    %78 = vector.extract_strided_slice %0 {offsets = [0, 4], sizes = [8, 1], strides = [1, 1]} : vector<8x11xi32> to vector<8x1xi32>
    %cst_26 = arith.constant dense<0xFF800000> : vector<8xf32>
    %79 = vector.multi_reduction <maximumf>, %77, %cst_26 [1] : vector<8x16xf32> to vector<8xf32>
    %80 = vector.shape_cast %79 : vector<8xf32> to vector<8x1xf32>
    %81 = vector.broadcast %80 : vector<8x1xf32> to vector<8x16xf32>
    %82 = arith.subf %77, %81 : vector<8x16xf32>
    %83 = math.exp %82 : vector<8x16xf32>
    %cst_27 = arith.constant dense<0.000000e+00> : vector<8xf32>
    %84 = vector.multi_reduction <add>, %83, %cst_27 [1] : vector<8x16xf32> to vector<8xf32>
    %85 = vector.shape_cast %84 : vector<8xf32> to vector<8x1xf32>
    %86 = math.log %85 : vector<8x1xf32>
    %87 = arith.addf %86, %80 : vector<8x1xf32>
    %88 = tpu.iota {dimensions = array<i32: 1>} : vector<8x16xi32>
    %89 = vector.broadcast %78 : vector<8x1xi32> to vector<8x16xi32>
    %90 = arith.cmpi eq, %88, %89 : vector<8x16xi32>
    %cst_28 = arith.constant 0.000000e+00 : f32
    %91 = vector.broadcast %cst_28 : f32 to vector<8x16xf32>
    %92 = arith.select %90, %77, %91 : vector<8x16xi1>, vector<8x16xf32>
    %cst_29 = arith.constant dense<0.000000e+00> : vector<8xf32>
    %93 = vector.multi_reduction <add>, %92, %cst_29 [1] : vector<8x16xf32> to vector<8xf32>
    %94 = vector.shape_cast %93 : vector<8xf32> to vector<8x1xf32>
    %95 = arith.subf %87, %94 : vector<8x1xf32>
    %c0_30 = arith.constant 0 : index
    %c0_31 = arith.constant 0 : index
    %96 = vector.load %arg6[%c0_30, %c0_31] : memref<8x16xf32, #tpu.memory_space<vmem>>, vector<8x16xf32>
    %97 = vector.extract_strided_slice %0 {offsets = [0, 5], sizes = [8, 1], strides = [1, 1]} : vector<8x11xi32> to vector<8x1xi32>
    %cst_32 = arith.constant dense<0xFF800000> : vector<8xf32>
    %98 = vector.multi_reduction <maximumf>, %96, %cst_32 [1] : vector<8x16xf32> to vector<8xf32>
    %99 = vector.shape_cast %98 : vector<8xf32> to vector<8x1xf32>
    %100 = vector.broadcast %99 : vector<8x1xf32> to vector<8x16xf32>
    %101 = arith.subf %96, %100 : vector<8x16xf32>
    %102 = math.exp %101 : vector<8x16xf32>
    %cst_33 = arith.constant dense<0.000000e+00> : vector<8xf32>
    %103 = vector.multi_reduction <add>, %102, %cst_33 [1] : vector<8x16xf32> to vector<8xf32>
    %104 = vector.shape_cast %103 : vector<8xf32> to vector<8x1xf32>
    %105 = math.log %104 : vector<8x1xf32>
    %106 = arith.addf %105, %99 : vector<8x1xf32>
    %107 = tpu.iota {dimensions = array<i32: 1>} : vector<8x16xi32>
    %108 = vector.broadcast %97 : vector<8x1xi32> to vector<8x16xi32>
    %109 = arith.cmpi eq, %107, %108 : vector<8x16xi32>
    %cst_34 = arith.constant 0.000000e+00 : f32
    %110 = vector.broadcast %cst_34 : f32 to vector<8x16xf32>
    %111 = arith.select %109, %96, %110 : vector<8x16xi1>, vector<8x16xf32>
    %cst_35 = arith.constant dense<0.000000e+00> : vector<8xf32>
    %112 = vector.multi_reduction <add>, %111, %cst_35 [1] : vector<8x16xf32> to vector<8xf32>
    %113 = vector.shape_cast %112 : vector<8xf32> to vector<8x1xf32>
    %114 = arith.subf %106, %113 : vector<8x1xf32>
    %c0_36 = arith.constant 0 : index
    %c0_37 = arith.constant 0 : index
    %115 = vector.load %arg7[%c0_36, %c0_37] : memref<8x16xf32, #tpu.memory_space<vmem>>, vector<8x16xf32>
    %116 = vector.extract_strided_slice %0 {offsets = [0, 6], sizes = [8, 1], strides = [1, 1]} : vector<8x11xi32> to vector<8x1xi32>
    %cst_38 = arith.constant dense<0xFF800000> : vector<8xf32>
    %117 = vector.multi_reduction <maximumf>, %115, %cst_38 [1] : vector<8x16xf32> to vector<8xf32>
    %118 = vector.shape_cast %117 : vector<8xf32> to vector<8x1xf32>
    %119 = vector.broadcast %118 : vector<8x1xf32> to vector<8x16xf32>
    %120 = arith.subf %115, %119 : vector<8x16xf32>
    %121 = math.exp %120 : vector<8x16xf32>
    %cst_39 = arith.constant dense<0.000000e+00> : vector<8xf32>
    %122 = vector.multi_reduction <add>, %121, %cst_39 [1] : vector<8x16xf32> to vector<8xf32>
    %123 = vector.shape_cast %122 : vector<8xf32> to vector<8x1xf32>
    %124 = math.log %123 : vector<8x1xf32>
    %125 = arith.addf %124, %118 : vector<8x1xf32>
    %126 = tpu.iota {dimensions = array<i32: 1>} : vector<8x16xi32>
    %127 = vector.broadcast %116 : vector<8x1xi32> to vector<8x16xi32>
    %128 = arith.cmpi eq, %126, %127 : vector<8x16xi32>
    %cst_40 = arith.constant 0.000000e+00 : f32
    %129 = vector.broadcast %cst_40 : f32 to vector<8x16xf32>
    %130 = arith.select %128, %115, %129 : vector<8x16xi1>, vector<8x16xf32>
    %cst_41 = arith.constant dense<0.000000e+00> : vector<8xf32>
    %131 = vector.multi_reduction <add>, %130, %cst_41 [1] : vector<8x16xf32> to vector<8xf32>
    %132 = vector.shape_cast %131 : vector<8xf32> to vector<8x1xf32>
    %133 = arith.subf %125, %132 : vector<8x1xf32>
    %c0_42 = arith.constant 0 : index
    %c0_43 = arith.constant 0 : index
    %134 = vector.load %arg8[%c0_42, %c0_43] : memref<8x16xf32, #tpu.memory_space<vmem>>, vector<8x16xf32>
    %135 = vector.extract_strided_slice %0 {offsets = [0, 7], sizes = [8, 1], strides = [1, 1]} : vector<8x11xi32> to vector<8x1xi32>
    %cst_44 = arith.constant dense<0xFF800000> : vector<8xf32>
    %136 = vector.multi_reduction <maximumf>, %134, %cst_44 [1] : vector<8x16xf32> to vector<8xf32>
    %137 = vector.shape_cast %136 : vector<8xf32> to vector<8x1xf32>
    %138 = vector.broadcast %137 : vector<8x1xf32> to vector<8x16xf32>
    %139 = arith.subf %134, %138 : vector<8x16xf32>
    %140 = math.exp %139 : vector<8x16xf32>
    %cst_45 = arith.constant dense<0.000000e+00> : vector<8xf32>
    %141 = vector.multi_reduction <add>, %140, %cst_45 [1] : vector<8x16xf32> to vector<8xf32>
    %142 = vector.shape_cast %141 : vector<8xf32> to vector<8x1xf32>
    %143 = math.log %142 : vector<8x1xf32>
    %144 = arith.addf %143, %137 : vector<8x1xf32>
    %145 = tpu.iota {dimensions = array<i32: 1>} : vector<8x16xi32>
    %146 = vector.broadcast %135 : vector<8x1xi32> to vector<8x16xi32>
    %147 = arith.cmpi eq, %145, %146 : vector<8x16xi32>
    %cst_46 = arith.constant 0.000000e+00 : f32
    %148 = vector.broadcast %cst_46 : f32 to vector<8x16xf32>
    %149 = arith.select %147, %134, %148 : vector<8x16xi1>, vector<8x16xf32>
    %cst_47 = arith.constant dense<0.000000e+00> : vector<8xf32>
    %150 = vector.multi_reduction <add>, %149, %cst_47 [1] : vector<8x16xf32> to vector<8xf32>
    %151 = vector.shape_cast %150 : vector<8xf32> to vector<8x1xf32>
    %152 = arith.subf %144, %151 : vector<8x1xf32>
    %c0_48 = arith.constant 0 : index
    %c0_49 = arith.constant 0 : index
    %153 = vector.load %arg9[%c0_48, %c0_49] : memref<8x16xf32, #tpu.memory_space<vmem>>, vector<8x16xf32>
    %154 = vector.extract_strided_slice %0 {offsets = [0, 8], sizes = [8, 1], strides = [1, 1]} : vector<8x11xi32> to vector<8x1xi32>
    %cst_50 = arith.constant dense<0xFF800000> : vector<8xf32>
    %155 = vector.multi_reduction <maximumf>, %153, %cst_50 [1] : vector<8x16xf32> to vector<8xf32>
    %156 = vector.shape_cast %155 : vector<8xf32> to vector<8x1xf32>
    %157 = vector.broadcast %156 : vector<8x1xf32> to vector<8x16xf32>
    %158 = arith.subf %153, %157 : vector<8x16xf32>
    %159 = math.exp %158 : vector<8x16xf32>
    %cst_51 = arith.constant dense<0.000000e+00> : vector<8xf32>
    %160 = vector.multi_reduction <add>, %159, %cst_51 [1] : vector<8x16xf32> to vector<8xf32>
    %161 = vector.shape_cast %160 : vector<8xf32> to vector<8x1xf32>
    %162 = math.log %161 : vector<8x1xf32>
    %163 = arith.addf %162, %156 : vector<8x1xf32>
    %164 = tpu.iota {dimensions = array<i32: 1>} : vector<8x16xi32>
    %165 = vector.broadcast %154 : vector<8x1xi32> to vector<8x16xi32>
    %166 = arith.cmpi eq, %164, %165 : vector<8x16xi32>
    %cst_52 = arith.constant 0.000000e+00 : f32
    %167 = vector.broadcast %cst_52 : f32 to vector<8x16xf32>
    %168 = arith.select %166, %153, %167 : vector<8x16xi1>, vector<8x16xf32>
    %cst_53 = arith.constant dense<0.000000e+00> : vector<8xf32>
    %169 = vector.multi_reduction <add>, %168, %cst_53 [1] : vector<8x16xf32> to vector<8xf32>
    %170 = vector.shape_cast %169 : vector<8xf32> to vector<8x1xf32>
    %171 = arith.subf %163, %170 : vector<8x1xf32>
    %c0_54 = arith.constant 0 : index
    %c0_55 = arith.constant 0 : index
    %172 = vector.load %arg10[%c0_54, %c0_55] : memref<8x16xf32, #tpu.memory_space<vmem>>, vector<8x16xf32>
    %173 = vector.extract_strided_slice %0 {offsets = [0, 9], sizes = [8, 1], strides = [1, 1]} : vector<8x11xi32> to vector<8x1xi32>
    %cst_56 = arith.constant dense<0xFF800000> : vector<8xf32>
    %174 = vector.multi_reduction <maximumf>, %172, %cst_56 [1] : vector<8x16xf32> to vector<8xf32>
    %175 = vector.shape_cast %174 : vector<8xf32> to vector<8x1xf32>
    %176 = vector.broadcast %175 : vector<8x1xf32> to vector<8x16xf32>
    %177 = arith.subf %172, %176 : vector<8x16xf32>
    %178 = math.exp %177 : vector<8x16xf32>
    %cst_57 = arith.constant dense<0.000000e+00> : vector<8xf32>
    %179 = vector.multi_reduction <add>, %178, %cst_57 [1] : vector<8x16xf32> to vector<8xf32>
    %180 = vector.shape_cast %179 : vector<8xf32> to vector<8x1xf32>
    %181 = math.log %180 : vector<8x1xf32>
    %182 = arith.addf %181, %175 : vector<8x1xf32>
    %183 = tpu.iota {dimensions = array<i32: 1>} : vector<8x16xi32>
    %184 = vector.broadcast %173 : vector<8x1xi32> to vector<8x16xi32>
    %185 = arith.cmpi eq, %183, %184 : vector<8x16xi32>
    %cst_58 = arith.constant 0.000000e+00 : f32
    %186 = vector.broadcast %cst_58 : f32 to vector<8x16xf32>
    %187 = arith.select %185, %172, %186 : vector<8x16xi1>, vector<8x16xf32>
    %cst_59 = arith.constant dense<0.000000e+00> : vector<8xf32>
    %188 = vector.multi_reduction <add>, %187, %cst_59 [1] : vector<8x16xf32> to vector<8xf32>
    %189 = vector.shape_cast %188 : vector<8xf32> to vector<8x1xf32>
    %190 = arith.subf %182, %189 : vector<8x1xf32>
    %c0_60 = arith.constant 0 : index
    %c0_61 = arith.constant 0 : index
    %191 = vector.load %arg11[%c0_60, %c0_61] : memref<8x16xf32, #tpu.memory_space<vmem>>, vector<8x16xf32>
    %192 = vector.extract_strided_slice %0 {offsets = [0, 10], sizes = [8, 1], strides = [1, 1]} : vector<8x11xi32> to vector<8x1xi32>
    %cst_62 = arith.constant dense<0xFF800000> : vector<8xf32>
    %193 = vector.multi_reduction <maximumf>, %191, %cst_62 [1] : vector<8x16xf32> to vector<8xf32>
    %194 = vector.shape_cast %193 : vector<8xf32> to vector<8x1xf32>
    %195 = vector.broadcast %194 : vector<8x1xf32> to vector<8x16xf32>
    %196 = arith.subf %191, %195 : vector<8x16xf32>
    %197 = math.exp %196 : vector<8x16xf32>
    %cst_63 = arith.constant dense<0.000000e+00> : vector<8xf32>
    %198 = vector.multi_reduction <add>, %197, %cst_63 [1] : vector<8x16xf32> to vector<8xf32>
    %199 = vector.shape_cast %198 : vector<8xf32> to vector<8x1xf32>
    %200 = math.log %199 : vector<8x1xf32>
    %201 = arith.addf %200, %194 : vector<8x1xf32>
    %202 = tpu.iota {dimensions = array<i32: 1>} : vector<8x16xi32>
    %203 = vector.broadcast %192 : vector<8x1xi32> to vector<8x16xi32>
    %204 = arith.cmpi eq, %202, %203 : vector<8x16xi32>
    %cst_64 = arith.constant 0.000000e+00 : f32
    %205 = vector.broadcast %cst_64 : f32 to vector<8x16xf32>
    %206 = arith.select %204, %191, %205 : vector<8x16xi1>, vector<8x16xf32>
    %cst_65 = arith.constant dense<0.000000e+00> : vector<8xf32>
    %207 = vector.multi_reduction <add>, %206, %cst_65 [1] : vector<8x16xf32> to vector<8xf32>
    %208 = vector.shape_cast %207 : vector<8xf32> to vector<8x1xf32>
    %209 = arith.subf %201, %208 : vector<8x1xf32>
    %210 = arith.addf %19, %38 : vector<8x1xf32>
    %211 = arith.addf %210, %57 : vector<8x1xf32>
    %212 = arith.addf %211, %76 : vector<8x1xf32>
    %213 = arith.addf %212, %95 : vector<8x1xf32>
    %214 = arith.addf %213, %114 : vector<8x1xf32>
    %215 = arith.addf %214, %133 : vector<8x1xf32>
    %216 = arith.addf %215, %152 : vector<8x1xf32>
    %217 = arith.addf %216, %171 : vector<8x1xf32>
    %218 = arith.addf %217, %190 : vector<8x1xf32>
    %219 = arith.addf %218, %209 : vector<8x1xf32>
    %cst_66 = arith.constant dense<0.000000e+00> : vector<1xf32>
    %220 = vector.multi_reduction <add>, %19, %cst_66 [0] : vector<8x1xf32> to vector<1xf32>
    %221 = vector.shape_cast %220 : vector<1xf32> to vector<1x1xf32>
    %cst_67 = arith.constant 1.250000e-01 : f32
    %222 = vector.broadcast %cst_67 : f32 to vector<1x1xf32>
    %223 = arith.mulf %221, %222 : vector<1x1xf32>
    %cst_68 = arith.constant dense<0.000000e+00> : vector<1xf32>
    %224 = vector.multi_reduction <add>, %219, %cst_68 [0] : vector<8x1xf32> to vector<1xf32>
    %225 = vector.shape_cast %224 : vector<1xf32> to vector<1x1xf32>
    %cst_69 = arith.constant 1.250000e-01 : f32
    %226 = vector.broadcast %cst_69 : f32 to vector<1x1xf32>
    %227 = arith.mulf %225, %226 : vector<1x1xf32>
    %228 = tpu.iota {dimensions = array<i32: 1>} : vector<1x128xi32>
    %c0_i32 = arith.constant 0 : i32
    %229 = vector.broadcast %c0_i32 : i32 to vector<1x128xi32>
    %230 = arith.cmpi eq, %228, %229 : vector<1x128xi32>
    %cst_70 = arith.constant 0.000000e+00 : f32
    %231 = vector.shape_cast %227 : vector<1x1xf32> to vector<1x1xf32>
    %232 = vector.broadcast %231 : vector<1x1xf32> to vector<1x128xf32>
    %233 = vector.broadcast %cst_70 : f32 to vector<1x128xf32>
    %234 = arith.select %230, %232, %233 : vector<1x128xi1>, vector<1x128xf32>
    %c1_i32 = arith.constant 1 : i32
    %235 = vector.broadcast %c1_i32 : i32 to vector<1x128xi32>
    %236 = arith.cmpi eq, %228, %235 : vector<1x128xi32>
    %cst_71 = arith.constant 0.000000e+00 : f32
    %237 = vector.shape_cast %223 : vector<1x1xf32> to vector<1x1xf32>
    %238 = vector.broadcast %237 : vector<1x1xf32> to vector<1x128xf32>
    %239 = vector.broadcast %cst_71 : f32 to vector<1x128xf32>
    %240 = arith.select %236, %238, %239 : vector<1x128xi1>, vector<1x128xf32>
    %241 = arith.addf %234, %240 : vector<1x128xf32>
    %c0_72 = arith.constant 0 : index
    %c0_73 = arith.constant 0 : index
    %242 = vector.load %arg12[%c0_72, %c0_73] : memref<1x128xf32, #tpu.memory_space<vmem>>, vector<1x128xf32>
    tpu.vector_store %arg12[%c0_72, %c0_73], %241 {strides = array<i32>} : memref<1x128xf32, #tpu.memory_space<vmem>>, vector<1x128xf32>,
    return
  }
}

</mosaic_0001>

<bundles_post_ra>
// kernel: _fused_multitask_ce.1
= control target key start
LH: loop header
LB: loop body
LE: loop exit
PB: predicated region body
PF: predicated region fallthrough
CT: control target
= control target key end

     0   :  { %17 = vsyncpa [#allocation3], 0  ;;  %s961_s0 = inlined_call_operand.hbm [shape: s32[8,11], index: 0, kind: input, shape index: {}]   ;;  %s962_s1 = inlined_call_operand.hbm [shape: f32[8,16], index: 1, kind: input, shape index: {}]   ;;  %s963_s2 = inlined_call_operand.hbm [shape: f32[8,16], index: 2, kind: input, shape index: {}]   ;;  %s964_s3 = inlined_call_operand.vmem [shape: f32[8,16], index: 3, kind: input, shape index: {}]   ;;  %s965_s4 = inlined_call_operand.hbm [shape: f32[8,16], index: 4, kind: input, shape index: {}]   ;;  %s966_s5 = inlined_call_operand.vmem [shape: f32[8,16], index: 5, kind: input, shape index: {}]   ;;  %s967_s6 = inlined_call_operand.hbm [shape: f32[8,16], index: 6, kind: input, shape index: {}]   ;;  %s968_s7 = inlined_call_operand.vmem [shape: f32[8,16], index: 7, kind: input, shape index: {}]   ;;  %s969_s8 = inlined_call_operand.hbm [shape: f32[8,16], index: 8, kind: input, shape index: {}]   ;;  %s970_s9 = inlined_call_operand.vmem [shape: f32[8,16], index: 9, kind: input, shape index: {}]   ;;  %s971_s10 = inlined_call_operand.hbm [shape: f32[8,16], index: 10, kind: input, shape index: {}]   ;;  %s972_s11 = inlined_call_operand.vmem [shape: f32[8,16], index: 11, kind: input, shape index: {}]   ;;  %s973_s12 = inlined_call_operand.vmem [shape: f32[1,128], index: 12, kind: output, shape index: {}]  }
   0x1   :  { %18 = vsyncpa [#allocation5], 0 }
   0x2   :  { %19 = vsyncpa [#allocation8], 0 }
   0x3   :  { %20 = vsyncpa [#allocation11], 0  ;;  %s642_s21 = smov [#allocation4]   ;;  %s643_s23 = smov [#allocation7]  }
   0x4   :  { %s37_s22 = sshll.u32 %s642_s21, 4  ;;  %s59_s24 = sshll.u32 %s643_s23, 4  ;;  %s38_s22 = int_to_ptr.vmem [resolvable:$true] %s37_s22  ;;  %s60_s24 = int_to_ptr.vmem [resolvable:$true] %s59_s24 }
   0x5   :  { %s480_s27 = scalar_lea.hbm %s962_s1, 128 }
   0x6   :  { %p481_p0 = scmp.ne.s32.totalorder %s962_s1, %s480_s27  ;;  %p484_p1 = scmp.lt.u32.totalorder %s480_s27, %s962_s1 }
   0x8   :  { %p486_p2 = pnand %p484_p1, %p481_p0 }
   0xa   :  { %489 = shalt.err (!%p486_p2)
}
   0xb   :  { %s490_s14 = scalar_lea.vmem %s38_s22, 128  ;;  %p495_p4 = scmp.lt.s32.totalorder %s38_s22, %s38_s22 }
   0xc   :  { %p491_p3 = scmp.ne.s32.totalorder %s38_s22, %s490_s14  ;;  %p496_p5 = scmp.lt.s32.totalorder %s490_s14, %s490_s14 }
   0xe   :  { %p497_p6 = por %p496_p5, %p495_p4 }
  0x10   :  { %p498_p7 = pnand %p497_p6, %p491_p3 }
  0x12   :  { %501 = shalt.err (!%p498_p7)
}
  0x13   :  { %40 = dma.hbm_to_vmem [thread:$0]  %s962_s1, 128, %s38_s22, [#allocation5]  }
  0x14   :  { %s502_s19 = scalar_lea.hbm %s965_s4, 128 }
  0x15   :  { %p503_p8 = scmp.ne.s32.totalorder %s965_s4, %s502_s19  ;;  %p506_p9 = scmp.lt.u32.totalorder %s502_s19, %s965_s4 }
  0x17   :  { %p508_p10 = pnand %p506_p9, %p503_p8 }
  0x19   :  { %511 = shalt.err (!%p508_p10)
}
  0x1a   :  { %s512_s26 = scalar_lea.vmem %s60_s24, 128  ;;  %p517_p12 = scmp.lt.s32.totalorder %s60_s24, %s60_s24 }
  0x1b   :  { %p513_p11 = scmp.ne.s32.totalorder %s60_s24, %s512_s26  ;;  %p518_p13 = scmp.lt.s32.totalorder %s512_s26, %s512_s26 }
  0x1d   :  { %p519_p0 = por %p518_p13, %p517_p12 }
  0x1f   :  { %p520_p1 = pnand %p519_p0, %p513_p11 }
  0x21   :  { %523 = shalt.err (!%p520_p1)
}
  0x22   :  { %62 = dma.hbm_to_vmem [thread:$0]  %s965_s4, 128, %s60_s24, [#allocation8]  }
  0x23   :  { %s644_s27 = smov [#allocation10]   ;;  %s645_s29 = smov [#allocation2]  }
  0x24   :  { %s83_s28 = sshll.u32 %s644_s27, 4  ;;  %s27_s30 = sshll.u32 %s645_s29, 4  ;;  %s84_s28 = int_to_ptr.vmem [resolvable:$true] %s83_s28  ;;  %s28_s30 = int_to_ptr.vmem [resolvable:$true] %s27_s30 }
  0x25   :  { %s524_s15 = scalar_lea.hbm %s969_s8, 128 }
  0x26   :  { %p525_p2 = scmp.ne.s32.totalorder %s969_s8, %s524_s15  ;;  %p528_p3 = scmp.lt.u32.totalorder %s524_s15, %s969_s8 }
  0x28   :  { %p530_p4 = pnand %p528_p3, %p525_p2 }
  0x2a   :  { %533 = shalt.err (!%p530_p4)
}
  0x2b   :  { %s534_s4 = scalar_lea.vmem %s84_s28, 128  ;;  %p539_p6 = scmp.lt.s32.totalorder %s84_s28, %s84_s28 }
  0x2c   :  { %p535_p5 = scmp.ne.s32.totalorder %s84_s28, %s534_s4  ;;  %p540_p7 = scmp.lt.s32.totalorder %s534_s4, %s534_s4 }
  0x2e   :  { %p541_p8 = por %p540_p7, %p539_p6 }
  0x30   :  { %p542_p9 = pnand %p541_p8, %p535_p5 }
  0x32   :  { %545 = shalt.err (!%p542_p9)
}
  0x33   :  { %86 = dma.hbm_to_vmem [thread:$0]  %s969_s8, 128, %s84_s28, [#allocation11]  }
  0x34   :  { %s546_s25 = scalar_lea.hbm %s961_s0, 128 }
  0x35   :  { %p547_p10 = scmp.ne.s32.totalorder %s961_s0, %s546_s25  ;;  %p550_p11 = scmp.lt.u32.totalorder %s546_s25, %s961_s0 }
  0x37   :  { %p552_p12 = pnand %p550_p11, %p547_p10 }
  0x39   :  { %555 = shalt.err (!%p552_p12)
}
  0x3a   :  { %s556_s29 = scalar_lea.vmem %s28_s30, 128  ;;  %p561_p0 = scmp.lt.s32.totalorder %s28_s30, %s28_s30 }
  0x3b   :  { %p557_p13 = scmp.ne.s32.totalorder %s28_s30, %s556_s29  ;;  %p562_p1 = scmp.lt.s32.totalorder %s556_s29, %s556_s29 }
  0x3d   :  { %p563_p2 = por %p562_p1, %p561_p0 }
  0x3f   :  { %p564_p3 = pnand %p563_p2, %p557_p13 }
  0x41   :  { %567 = shalt.err (!%p564_p3)
}
  0x42   :  { %30 = dma.hbm_to_vmem [thread:$0]  %s961_s0, 128, %s28_s30, [#allocation3]  }
  0x43   :  { %s646_s13 = smov [#allocation6]   ;;  %s647_s15 = smov [#allocation9]  }
  0x44   :  { %s47_s14 = sshll.u32 %s646_s13, 4  ;;  %s71_s16 = sshll.u32 %s647_s15, 4  ;;  %s48_s14 = int_to_ptr.vmem [resolvable:$true] %s47_s14  ;;  %s72_s16 = int_to_ptr.vmem [resolvable:$true] %s71_s16 }
  0x45   :  { %s568_s19 = scalar_lea.hbm %s963_s2, 128 }
  0x46   :  { %p569_p4 = scmp.ne.s32.totalorder %s963_s2, %s568_s19  ;;  %p572_p5 = scmp.lt.u32.totalorder %s568_s19, %s963_s2 }
  0x48   :  { %p574_p6 = pnand %p572_p5, %p569_p4 }
  0x4a   :  { %577 = shalt.err (!%p574_p6)
}
  0x4b   :  { %s578_s0 = scalar_lea.vmem %s48_s14, 128  ;;  %p583_p8 = scmp.lt.s32.totalorder %s48_s14, %s48_s14 }
  0x4c   :  { %p579_p7 = scmp.ne.s32.totalorder %s48_s14, %s578_s0  ;;  %p584_p9 = scmp.lt.s32.totalorder %s578_s0, %s578_s0 }
  0x4e   :  { %p585_p10 = por %p584_p9, %p583_p8 }
  0x50   :  { %p586_p11 = pnand %p585_p10, %p579_p7 }
  0x52   :  { %589 = shalt.err (!%p586_p11)
}
  0x53   :  { %50 = dma.hbm_to_vmem [thread:$0]  %s963_s2, 128, %s48_s14, [#allocation5]  }
  0x54   :  { %s590_s1 = scalar_lea.hbm %s967_s6, 128 }
  0x55   :  { %p591_p12 = scmp.ne.s32.totalorder %s967_s6, %s590_s1  ;;  %p594_p13 = scmp.lt.u32.totalorder %s590_s1, %s967_s6 }
  0x57   :  { %p596_p0 = pnand %p594_p13, %p591_p12 }
  0x59   :  { %599 = shalt.err (!%p596_p0)
}
  0x5a   :  { %s600_s28 = scalar_lea.vmem %s72_s16, 128  ;;  %p605_p2 = scmp.lt.s32.totalorder %s72_s16, %s72_s16 }
  0x5b   :  { %p601_p1 = scmp.ne.s32.totalorder %s72_s16, %s600_s28  ;;  %p606_p3 = scmp.lt.s32.totalorder %s600_s28, %s600_s28 }
  0x5d   :  { %p607_p4 = por %p606_p3, %p605_p2 }
  0x5f   :  { %p608_p5 = pnand %p607_p4, %p601_p1 }
  0x61   :  { %611 = shalt.err (!%p608_p5)
}
  0x62   :  { %74 = dma.hbm_to_vmem [thread:$0]  %s967_s6, 128, %s72_s16, [#allocation8]  }
  0x63   :  { %s648_s14 = smov [#allocation12]   ;;  %s612_s19 = scalar_lea.hbm %s971_s10, 128 }
  0x64   :  { %s95_s15 = sshll.u32 %s648_s14, 4  ;;  %p613_p6 = scmp.ne.s32.totalorder %s971_s10, %s612_s19  ;;  %s96_s15 = int_to_ptr.vmem [resolvable:$true] %s95_s15 }
  0x65   :  { %p616_p7 = scmp.lt.u32.totalorder %s612_s19, %s971_s10 }
  0x67   :  { %p618_p8 = pnand %p616_p7, %p613_p6 }
  0x69   :  { %621 = shalt.err (!%p618_p8)
}
  0x6a   :  { %s622_s0 = scalar_lea.vmem %s96_s15, 128  ;;  %p627_p10 = scmp.lt.s32.totalorder %s96_s15, %s96_s15 }
  0x6b   :  { %p623_p9 = scmp.ne.s32.totalorder %s96_s15, %s622_s0  ;;  %p628_p11 = scmp.lt.s32.totalorder %s622_s0, %s622_s0 }
  0x6d   :  { %p629_p12 = por %p628_p11, %p627_p10 }
  0x6f   :  { %p630_p13 = pnand %p629_p12, %p623_p9 }
  0x71   :  { %633 = shalt.err (!%p630_p13)
}
  0x72   :  { %98 = dma.hbm_to_vmem [thread:$0]  %s971_s10, 128, %s96_s15, [#allocation11]  }
  0x73   :  { %634 = dma.done.wait [#allocation3], 128  }
  0x74   :  { %635 = vsyncadd [#allocation3], 4294967168 }
  0x75   :  { %636 = dma.done.wait [#allocation5], 256  }
  0x76   :  { %637 = vsyncadd [#allocation5], 4294967040 }
  0x77   :  { %638 = dma.done.wait [#allocation8], 256  }
  0x78   :  { %639 = vsyncadd [#allocation8], 4294967040 }
  0x79   :  { %640 = dma.done.wait [#allocation11], 256  }
  0x7a   :  { %641 = vsyncadd [#allocation11], 4294967040  ;;  %v649_v0 = vmov 0   ;;  %v650_v1 = vmov 1   ;;  %vm124_vm0 = vcmask 130048   ;;  %v809_v2 = vld [vmem:[#allocation2] sm:$0xff]  ;;  %v137_v17 = vlaneseq }
  0x7b   :  { %424 = vset.pattern.permute.xlu1 %v649_v0  ;;  %425 = vset.pattern.permute.xlu0 %v650_v1  ;;  %v123_v3 = vld [vmem:[#allocation4] sm:$0xff]  ;;  %v148_v5 = vld [vmem:[#allocation6] sm:$0xff]  ;;  %v651_v7 = vmov 2   ;;  %v170_v8 = vld [vmem:[%s964_s3] sm:$0xff]  ;;  %v652_v9 = vmov 3   ;;  %v653_v11 = vmov 4  }
  0x7c   :  { %140 = vperm.xlu1 %424, %v809_v2   ;;  %v125_v4 = vsel %vm124_vm0, %v123_v3, -inf  ;;  %v149_v6 = vsel %vm124_vm0, %v148_v5, -inf  ;;  %v171_v10 = vsel %vm124_vm0, %v170_v8, -inf  ;;  %v192_v12 = vld [vmem:[#allocation7] sm:$0xff]  ;;  %v214_v14 = vld [vmem:[%s966_s5] sm:$0xff]  ;;  %v654_v16 = vmov 5  }
  0x7d   :  { %126 = vmax.xlane.f32.xlu0 %v125_v4  ;;  %v193_v13 = vsel %vm124_vm0, %v192_v12, -inf  ;;  %v215_v15 = vsel %vm124_vm0, %v214_v14, -inf  ;;  %v827_v18 = vand.u32 127, %v137_v17  ;;  %v844_v37 = vld [vmem:[#allocation9] sm:$0xff]  ;;  %v864_v61 = vld [vmem:[#allocation10] sm:$0xff]  ;;  %v875_v1 = vld [vmem:[#allocation12] sm:$0xff] }
  0x7e   :  { %v237_v39 = vsel %vm124_vm0, %v844_v37, -inf  ;;  %v281_v62 = vsel %vm124_vm0, %v864_v61, -inf  ;;  %v871_v63 = vld [vmem:[%s970_s9] sm:$0xff] }
  0x7f   :  { %v303_v0 = vsel %vm124_vm0, %v871_v63, -inf  ;;  %vm392_vm12 = vcmp.eq.s32.totalorder %v827_v18, 0  ;;  %vm394_vm13 = vcmp.eq.s32.totalorder %v827_v18, 1 }
  0x80   :  { %426 = vset.pattern.permute.xlu1 %v651_v7 }
  0x81   :  { %150 = vmax.xlane.f32.xlu0 %v149_v6 }
  0x97   :  { %162 = vperm.xlu0 %425, %v809_v2  }
  0x9b   :  { %427 = vset.pattern.permute.xlu0 %v652_v9 }
  0x9c   :  { %206 = vperm.xlu0 %427, %v809_v2  }
  0xa0   :  { %172 = vmax.xlane.f32.xlu1 %v171_v10 }
  0xb1   :  { %184 = vperm.xlu1 %426, %v809_v2  }
  0xb5   :  { %428 = vset.pattern.permute.xlu1 %v653_v11 }
  0xd5   :  { %194 = vmax.xlane.f32.xlu1 %v193_v13 }
  0xd9   :  { %216 = vmax.xlane.f32.xlu1 %v215_v15 }
  0xea   :  { %228 = vperm.xlu1 %428, %v809_v2  }
  0xee   :  { %429 = vset.pattern.permute.xlu1 %v654_v16 }
  0xfb   :  { %v141_v19 = vpop.permute.xlu1 %140 }
  0xfc   :  { %vm142_vm1 = vcmp.eq.s32.totalorder %v827_v18, %v141_v19 }
  0xfd   :  { %v143_v20 = vsel %vm142_vm1, %v123_v3, 0.0 }
  0xfe   :  { %v144_v22 = vsel %vm124_vm0, %v143_v20, 0.0 }
 0x10a   :  { %v830_v21 = vpop.xlane.xlu0 %126 }
 0x10b   :  { %v128_v30 = vsub.f32 %v123_v3, %v830_v21  ;;  %v325_v3 = vsel %vm124_vm0, %v875_v1, -inf }
 0x10d   :  { %v129_v31 = vmul.f32 1.442695, %v128_v30 }
 0x10e   :  { %145 = vadd.xlane.f32.xlu1 %v144_v22  ;;  %v833_v23 = vpop.xlane.xlu0 %150 }
 0x10f   :  { %v152_v32 = vsub.f32 %v148_v5, %v833_v23  ;;  %436 = vpow2.f32 %v129_v31 }
 0x111   :  { %v153_v34 = vmul.f32 1.442695, %v152_v32 }
 0x113   :  { %438 = vpow2.f32 %v153_v34 }
 0x116   :  { %v163_v24 = vpop.permute.xlu0 %162 }
 0x117   :  { %vm164_vm2 = vcmp.eq.s32.totalorder %v827_v18, %v163_v24 }
 0x118   :  { %v165_v25 = vsel %vm164_vm2, %v148_v5, 0.0 }
 0x119   :  { %v166_v26 = vsel %vm124_vm0, %v165_v25, 0.0  ;;  %v437_v40 = vpop.eup %436 }
 0x11a   :  { %167 = vadd.xlane.f32.xlu1 %v166_v26  ;;  %v131_v41 = vsel %vm124_vm0, %v437_v40, 0.0 }
 0x11b   :  { %v207_v27 = vpop.permute.xlu0 %206 }
 0x11c   :  { %vm208_vm3 = vcmp.eq.s32.totalorder %v827_v18, %v207_v27 }
 0x11d   :  { %v209_v28 = vsel %vm208_vm3, %v192_v12, 0.0  ;;  %v439_v42 = vpop.eup %438 }
 0x11e   :  { %v210_v29 = vsel %vm124_vm0, %v209_v28, 0.0  ;;  %v155_v43 = vsel %vm124_vm0, %v439_v42, 0.0 }
 0x11f   :  { %211 = vadd.xlane.f32.xlu1 %v210_v29 }
 0x12d   :  { %v841_v33 = vpop.xlane.xlu1 %172 }
 0x12e   :  { %v174_v44 = vsub.f32 %v170_v8, %v841_v33 }
 0x130   :  { %v175_v45 = vmul.f32 1.442695, %v174_v44 }
 0x131   :  { %v185_v35 = vpop.permute.xlu1 %184 }
 0x132   :  { %vm186_vm4 = vcmp.eq.s32.totalorder %v827_v18, %v185_v35  ;;  %440 = vpow2.f32 %v175_v45 }
 0x133   :  { %v187_v36 = vsel %vm186_vm4, %v170_v8, 0.0 }
 0x134   :  { %v188_v38 = vsel %vm124_vm0, %v187_v36, 0.0 }
 0x135   :  { %189 = vadd.xlane.f32.xlu0 %v188_v38 }
 0x139   :  { %238 = vmax.xlane.f32.xlu0 %v237_v39 }
 0x13c   :  { %v441_v55 = vpop.eup %440 }
 0x13d   :  { %132 = vadd.xlane.f32.xlu0 %v131_v41  ;;  %v177_v57 = vsel %vm124_vm0, %v441_v55, 0.0 }
 0x141   :  { %156 = vadd.xlane.f32.xlu0 %v155_v43 }
 0x162   :  { %v852_v46 = vpop.xlane.xlu1 %194 }
 0x163   :  { %v196_v47 = vsub.f32 %v192_v12, %v852_v46 }
 0x165   :  { %v197_v48 = vmul.f32 1.442695, %v196_v47 }
 0x166   :  { %v855_v49 = vpop.xlane.xlu1 %216 }
 0x167   :  { %442 = vpow2.f32 %v197_v48  ;;  %v218_v50 = vsub.f32 %v214_v14, %v855_v49 }
 0x169   :  { %v219_v51 = vmul.f32 1.442695, %v218_v50 }
 0x16a   :  { %v229_v52 = vpop.permute.xlu1 %228 }
 0x16b   :  { %444 = vpow2.f32 %v219_v51  ;;  %vm230_vm5 = vcmp.eq.s32.totalorder %v827_v18, %v229_v52  ;;  %v655_v52 = vmov 6  }
 0x16c   :  { %v231_v53 = vsel %vm230_vm5, %v214_v14, 0.0  ;;  %430 = vset.pattern.permute.xlu0 %v655_v52 }
 0x16d   :  { %v232_v54 = vsel %vm124_vm0, %v231_v53, 0.0  ;;  %v656_v53 = vmov 7  }
 0x16e   :  { %233 = vadd.xlane.f32.xlu1 %v232_v54  ;;  %v659_v54 = vmov 10  }
 0x171   :  { %v443_v56 = vpop.eup %442 }
 0x172   :  { %178 = vadd.xlane.f32.xlu1 %v177_v57  ;;  %v199_v58 = vsel %vm124_vm0, %v443_v56, 0.0 }
 0x173   :  { %200 = vadd.xlane.f32.xlu0 %v199_v58 }
 0x175   :  { %v445_v59 = vpop.eup %444 }
 0x176   :  { %v221_v60 = vsel %vm124_vm0, %v445_v59, 0.0 }
 0x177   :  { %222 = vadd.xlane.f32.xlu1 %v221_v60 }
 0x188   :  { %250 = vperm.xlu1 %429, %v809_v2  }
 0x18c   :  { %431 = vset.pattern.permute.xlu1 %v656_v53 }
 0x19b   :  { %v146_v13 = vpop.xlane.xlu1 %145 }
 0x1a7   :  { %v168_v20 = vpop.xlane.xlu1 %167 }
 0x1ac   :  { %282 = vmax.xlane.f32.xlu1 %v281_v62  ;;  %v212_v26 = vpop.xlane.xlu1 %211 }
 0x1b0   :  { %304 = vmax.xlane.f32.xlu1 %v303_v0 }
 0x1b4   :  { %326 = vmax.xlane.f32.xlu1 %v325_v3 }
 0x1c2   :  { %v190_v4 = vpop.xlane.xlu0 %189 }
 0x1c5   :  { %294 = vperm.xlu1 %431, %v809_v2  }
 0x1c6   :  { %v879_v5 = vpop.xlane.xlu0 %238 }
 0x1c7   :  { %v240_v6 = vsub.f32 %v844_v37, %v879_v5 }
 0x1c9   :  { %v241_v7 = vmul.f32 1.442695, %v240_v6 }
 0x1ca   :  { %v133_v8 = vpop.xlane.xlu0 %132 }
 0x1cb   :  { %446 = vpow2.f32 %v241_v7 }
 0x1cc   :  { %448 = vlog2.f32 %v133_v8 }
 0x1ce   :  { %v157_v9 = vpop.xlane.xlu0 %156 }
 0x1cf   :  { %450 = vlog2.f32 %v157_v9 }
 0x1d5   :  { %v447_v10 = vpop.eup %446 }
 0x1d6   :  { %v449_v11 = vpop.eup %448  ;;  %v243_v12 = vsel %vm124_vm0, %v447_v10, 0.0 }
 0x1d7   :  { %v135_v14 = vmul.f32 0.6931472, %v449_v11  ;;  %244 = vadd.xlane.f32.xlu0 %v243_v12 }
 0x1d9   :  { %v451_v15 = vpop.eup %450  ;;  %v136_v16 = vadd.f32 %v135_v14, %v830_v21  ;;  %v346_v14 = vld [vmem:[%s972_s11] sm:$0xff] }
 0x1da   :  { %v159_v17 = vmul.f32 0.6931472, %v451_v15  ;;  %v347_v15 = vsel %vm124_vm0, %v346_v14, -inf }
 0x1db   :  { %v885_v19 = vsub.f32 %v136_v16, %v146_v13 }
 0x1dc   :  { %v160_v22 = vadd.f32 %v159_v17, %v833_v23  ;;  %v894_v23 = vld [vmem:[%s968_s7] sm:$0xff] }
 0x1dd   :  { %v259_v40 = vsel %vm124_vm0, %v894_v23, -inf }
 0x1de   :  { %v169_v24 = vsub.f32 %v160_v22, %v168_v20 }
 0x1e0   :  { %v368_v25 = vadd.f32 %v169_v24, %v885_v19 }
 0x1fb   :  { %v234_v27 = vpop.xlane.xlu1 %233 }
 0x1ff   :  { %v179_v28 = vpop.xlane.xlu1 %178 }
 0x200   :  { %452 = vlog2.f32 %v179_v28  ;;  %v201_v29 = vpop.xlane.xlu0 %200 }
 0x201   :  { %454 = vlog2.f32 %v201_v29 }
 0x204   :  { %v223_v30 = vpop.xlane.xlu1 %222 }
 0x205   :  { %456 = vlog2.f32 %v223_v30 }
 0x208   :  { %v251_v31 = vpop.permute.xlu1 %250 }
 0x209   :  { %vm252_vm6 = vcmp.eq.s32.totalorder %v827_v18, %v251_v31 }
 0x20a   :  { %v453_v21 = vpop.eup %452  ;;  %v253_v32 = vsel %vm252_vm6, %v844_v37, 0.0 }
 0x20b   :  { %v455_v34 = vpop.eup %454  ;;  %v181_v35 = vmul.f32 0.6931472, %v453_v21  ;;  %v254_v36 = vsel %vm124_vm0, %v253_v32, 0.0 }
 0x20c   :  { %v203_v38 = vmul.f32 0.6931472, %v455_v34  ;;  %255 = vadd.xlane.f32.xlu0 %v254_v36 }
 0x20d   :  { %v182_v39 = vadd.f32 %v181_v35, %v841_v33  ;;  %v657_v33 = vmov 8  }
 0x20e   :  { %v204_v41 = vadd.f32 %v203_v38, %v852_v46  ;;  %432 = vset.pattern.permute.xlu1 %v657_v33  ;;  %v658_v46 = vmov 9  }
 0x20f   :  { %v457_v42 = vpop.eup %456  ;;  %v191_v37 = vsub.f32 %v182_v39, %v190_v4  ;;  %316 = vperm.xlu1 %432, %v809_v2  }
 0x210   :  { %v213_v43 = vsub.f32 %v204_v41, %v212_v26  ;;  %v225_v44 = vmul.f32 0.6931472, %v457_v42  ;;  %260 = vmax.xlane.f32.xlu0 %v259_v40 }
 0x211   :  { %v369_v45 = vadd.f32 %v368_v25, %v191_v37 }
 0x212   :  { %v226_v47 = vadd.f32 %v225_v44, %v855_v49 }
 0x213   :  { %v370_v48 = vadd.f32 %v369_v45, %v213_v43  ;;  %433 = vset.pattern.permute.xlu1 %v658_v46 }
 0x214   :  { %v235_v50 = vsub.f32 %v226_v47, %v234_v27  ;;  %338 = vperm.xlu1 %433, %v809_v2  }
 0x216   :  { %v371_v51 = vadd.f32 %v370_v48, %v235_v50 }
 0x218   :  { %434 = vset.pattern.permute.xlu1 %v659_v54 }
 0x219   :  { %360 = vperm.xlu1 %434, %v809_v2  }
 0x239   :  { %v915_v7 = vpop.xlane.xlu1 %282 }
 0x23a   :  { %v284_v8 = vsub.f32 %v864_v61, %v915_v7 }
 0x23c   :  { %v285_v9 = vmul.f32 1.442695, %v284_v8 }
 0x264   :  { %v245_v49 = vpop.xlane.xlu0 %244 }
 0x265   :  { %458 = vlog2.f32 %v245_v49 }
 0x26f   :  { %v459_v55 = vpop.eup %458 }
 0x270   :  { %v247_v56 = vmul.f32 0.6931472, %v459_v55 }
 0x272   :  { %v248_v57 = vadd.f32 %v247_v56, %v879_v5  ;;  %v917_v5 = vpop.xlane.xlu1 %304 }
 0x273   :  { %v306_v10 = vsub.f32 %v871_v63, %v917_v5 }
 0x275   :  { %v307_v12 = vmul.f32 1.442695, %v306_v10 }
 0x276   :  { %v923_v11 = vpop.xlane.xlu1 %326 }
 0x277   :  { %v328_v13 = vsub.f32 %v875_v1, %v923_v11 }
 0x27a   :  { %v295_v32 = vpop.permute.xlu1 %294 }
 0x27b   :  { %vm296_vm8 = vcmp.eq.s32.totalorder %v827_v18, %v295_v32 }
 0x27c   :  { %v297_v39 = vsel %vm296_vm8, %v864_v61, 0.0 }
 0x28e   :  { %v317_v34 = vpop.permute.xlu1 %316 }
 0x28f   :  { %vm318_vm9 = vcmp.eq.s32.totalorder %v827_v18, %v317_v34 }
 0x290   :  { %v319_v40 = vsel %vm318_vm9, %v871_v63, 0.0 }
 0x291   :  { %v320_v37 = vsel %vm124_vm0, %v319_v40, 0.0 }
 0x293   :  { %v339_v36 = vpop.permute.xlu1 %338 }
 0x294   :  { %vm340_vm10 = vcmp.eq.s32.totalorder %v827_v18, %v339_v36 }
 0x295   :  { %v341_v42 = vsel %vm340_vm10, %v875_v1, 0.0 }
 0x296   :  { %v342_v43 = vsel %vm124_vm0, %v341_v42, 0.0 }
 0x298   :  { %v361_v41 = vpop.permute.xlu1 %360 }
 0x299   :  { %v256_v58 = vpop.xlane.xlu0 %255  ;;  %vm362_vm11 = vcmp.eq.s32.totalorder %v827_v18, %v361_v41 }
 0x29a   :  { %v257_v59 = vsub.f32 %v248_v57, %v256_v58  ;;  %v363_v61 = vsel %vm362_vm11, %v346_v14, 0.0  ;;  %v378_v58 = vrot.slane %v885_v19, 4 }
 0x29b   :  { %v364_v44 = vsel %vm124_vm0, %v363_v61, 0.0 }
 0x29c   :  { %v907_v60 = vadd.f32 %v371_v51, %v257_v59 }
 0x29d   :  { %v909_v62 = vpop.xlane.xlu0 %260 }
 0x29e   :  { %v262_v0 = vsub.f32 %v894_v23, %v909_v62 }
 0x2a0   :  { %v263_v3 = vmul.f32 1.442695, %v262_v0 }
 0x2a2   :  { %460 = vpow2.f32 %v263_v3 }
 0x2a3   :  { %462 = vpow2.f32 %v285_v9 }
 0x2a4   :  { %464 = vpow2.f32 %v307_v12 }
 0x2ac   :  { %v461_v4 = vpop.eup %460 }
 0x2ad   :  { %v265_v6 = vsel %vm124_vm0, %v461_v4, 0.0  ;;  %v463_v16 = vpop.eup %462 }
 0x2ae   :  { %266 = vadd.xlane.f32.xlu0 %v265_v6  ;;  %v287_v17 = vsel %vm124_vm0, %v463_v16, 0.0  ;;  %v465_v20 = vpop.eup %464  ;;  %v379_v6 = vadd.f32 %v378_v58, %v885_v19 }
 0x2af   :  { %v309_v22 = vsel %vm124_vm0, %v465_v20, 0.0 }
 0x2c4   :  { %272 = vperm.xlu0 %430, %v809_v2   ;;  %v329_v2 = vmul.f32 1.442695, %v328_v13 }
 0x2c6   :  { %466 = vpow2.f32 %v329_v2 }
 0x2c8   :  { %435 = vset.pattern.permute.xlu0 %v659_v54 }
 0x2d0   :  { %v467_v24 = vpop.eup %466 }
 0x2d1   :  { %v331_v25 = vsel %vm124_vm0, %v467_v24, 0.0 }
 0x2e3   :  { %348 = vmax.xlane.f32.xlu0 %v347_v15  ;;  %v380_v15 = vrot.slane %v379_v6, 2 }
 0x2e7   :  { %288 = vadd.xlane.f32.xlu0 %v287_v17 }
 0x2eb   :  { %310 = vadd.xlane.f32.xlu0 %v309_v22  ;;  %v381_v22 = vadd.f32 %v380_v15, %v379_v6 }
 0x2ef   :  { %332 = vadd.xlane.f32.xlu0 %v331_v25 }
 0x33b   :  { %v267_v26 = vpop.xlane.xlu0 %266 }
 0x343   :  { %v273_v27 = vpop.permute.xlu0 %272 }
 0x344   :  { %vm274_vm7 = vcmp.eq.s32.totalorder %v827_v18, %v273_v27 }
 0x345   :  { %v275_v28 = vsel %vm274_vm7, %v894_v23, 0.0  ;;  %v298_v23 = vsel %vm124_vm0, %v297_v39, 0.0 }
 0x346   :  { %v276_v29 = vsel %vm124_vm0, %v275_v28, 0.0 }
 0x347   :  { %277 = vadd.xlane.f32.xlu1 %v276_v29 }
 0x370   :  { %v349_v30 = vpop.xlane.xlu0 %348 }
 0x371   :  { %v350_v31 = vsub.f32 %v346_v14, %v349_v30 }
 0x373   :  { %v351_v21 = vmul.f32 1.442695, %v350_v31 }
 0x374   :  { %v289_v51 = vpop.xlane.xlu0 %288 }
 0x375   :  { %468 = vpow2.f32 %v351_v21 }
 0x376   :  { %470 = vlog2.f32 %v267_v26 }
 0x377   :  { %472 = vlog2.f32 %v289_v51 }
 0x378   :  { %v311_v52 = vpop.xlane.xlu0 %310 }
 0x379   :  { %474 = vlog2.f32 %v311_v52 }
 0x37c   :  { %v333_v53 = vpop.xlane.xlu0 %332 }
 0x37d   :  { %476 = vlog2.f32 %v333_v53 }
 0x37f   :  { %v469_v35 = vpop.eup %468 }
 0x380   :  { %v353_v38 = vsel %vm124_vm0, %v469_v35, 0.0  ;;  %v471_v45 = vpop.eup %470 }
 0x381   :  { %354 = vadd.xlane.f32.xlu0 %v353_v38  ;;  %v269_v47 = vmul.f32 0.6931472, %v471_v45  ;;  %v473_v33 = vpop.eup %472 }
 0x382   :  { %v291_v49 = vmul.f32 0.6931472, %v473_v33 }
 0x383   :  { %v270_v63 = vadd.f32 %v269_v47, %v909_v62  ;;  %v475_v54 = vpop.eup %474 }
 0x384   :  { %v313_v57 = vmul.f32 0.6931472, %v475_v54  ;;  %v292_v62 = vadd.f32 %v291_v49, %v915_v7 }
 0x385   :  { %299 = vadd.xlane.f32.xlu0 %v298_v23 }
 0x386   :  { %v314_v3 = vadd.f32 %v313_v57, %v917_v5  ;;  %v382_v5 = vrot.slane %v381_v22, 1 }
 0x387   :  { %v477_v55 = vpop.eup %476 }
 0x388   :  { %v335_v59 = vmul.f32 0.6931472, %v477_v55  ;;  %v383_v19 = vadd.f32 %v382_v5, %v381_v22 }
 0x389   :  { %321 = vadd.xlane.f32.xlu0 %v320_v37 }
 0x38a   :  { %v336_v9 = vadd.f32 %v335_v59, %v923_v11  ;;  %v384_v11 = vmul.f32 0.125, %v383_v19 }
 0x38c   :  { %v395_v21 = vsel %vm394_vm13, %v384_v11, 0.0 }
 0x38d   :  { %343 = vadd.xlane.f32.xlu0 %v342_v43 }
 0x391   :  { %365 = vadd.xlane.f32.xlu0 %v364_v44 }
 0x3d4   :  { %v278_v48 = vpop.xlane.xlu1 %277 }
 0x3d5   :  { %v279_v50 = vsub.f32 %v270_v63, %v278_v48 }
 0x3d7   :  { %v373_v1 = vadd.f32 %v907_v60, %v279_v50 }
 0x40e   :  { %v355_v46 = vpop.xlane.xlu0 %354 }
 0x40f   :  { %478 = vlog2.f32 %v355_v46 }
 0x412   :  { %v300_v56 = vpop.xlane.xlu0 %299 }
 0x413   :  { %v301_v0 = vsub.f32 %v292_v62, %v300_v56 }
 0x415   :  { %v374_v13 = vadd.f32 %v373_v1, %v301_v0 }
 0x416   :  { %v322_v60 = vpop.xlane.xlu0 %321 }
 0x417   :  { %v323_v8 = vsub.f32 %v314_v3, %v322_v60 }
 0x419   :  { %v479_v4 = vpop.eup %478  ;;  %v375_v16 = vadd.f32 %v374_v13, %v323_v8 }
 0x41a   :  { %v357_v10 = vmul.f32 0.6931472, %v479_v4  ;;  %v344_v12 = vpop.xlane.xlu0 %343 }
 0x41b   :  { %v345_v2 = vsub.f32 %v336_v9, %v344_v12 }
 0x41c   :  { %v358_v14 = vadd.f32 %v357_v10, %v349_v30 }
 0x41d   :  { %v376_v20 = vadd.f32 %v375_v16, %v345_v2 }
 0x41e   :  { %v366_v17 = vpop.xlane.xlu0 %365 }
 0x41f   :  { %v367_v7 = vsub.f32 %v358_v14, %v366_v17 }
 0x421   :  { %v377_v24 = vadd.f32 %v376_v20, %v367_v7 }
 0x423   :  { %v385_v25 = vrot.slane %v377_v24, 4 }
 0x425   :  { %v386_v26 = vadd.f32 %v385_v25, %v377_v24 }
 0x427   :  { %v387_v27 = vrot.slane %v386_v26, 2 }
 0x429   :  { %v388_v28 = vadd.f32 %v387_v27, %v386_v26 }
 0x42b   :  { %v389_v29 = vrot.slane %v388_v28, 1 }
 0x42d   :  { %v390_v31 = vadd.f32 %v389_v29, %v388_v28 }
 0x42f   :  { %v391_v30 = vmul.f32 0.125, %v390_v31 }
 0x431   :  { %v393_v32 = vsel %vm392_vm12, %v391_v30, 0.0 }
 0x432   :  { %v396_v34 = vadd.f32 %v395_v21, %v393_v32 }
 0x434   :  { %397 = vst [vmem:[%s973_s12] sm:$0x1] %v396_v34 }
 0x435   :  { %402 = vsyncpa [#allocation3], 1 }
 0x436   :  { %403 = vsyncpa [#allocation5], 1 }
 0x437   :  { %404 = vsyncpa [#allocation8], 1 }
 0x438   :  { %405 = vsyncpa [#allocation11], 1 }

</bundles_post_ra>
